<compile_context>
chip_gen: v6e
topology: v6e:2x2x1
jax: 0.10.0
libtpu: 0.0.40
codegen_flags: <defaults>
</compile_context>

<pallas_src>
import math

import jax
import jax.numpy as jnp
from jax.experimental import pallas as pl
from jax.experimental.pallas import tpu as pltpu


def _round_up(x, m):
    return ((x + m - 1) // m) * m


def _cdiv(a, b):
    return (a + b - 1) // b


def _vmem_capacity_bytes():
    # Per-generation physical VMEM (v5e/v6e: 128 MiB, v7x: 64 MiB per TC).
    try:
        return int(pltpu.get_tpu_info().vmem_capacity_bytes)
    except Exception:
        return 64 << 20  # conservative fallback (v7x per-TC size)


def _batch_axis_semantics():
    # v7x has 2 TensorCores per chip: CORE_PARALLEL shards the batch grid axis
    # across them (memory-bound kernel scales with the per-TC HBM bandwidth).
    # On single-TC v5e/v6e, "parallel" is the right (harmless) declaration.
    try:
        kind = jax.devices()[0].device_kind.lower()
    except Exception:
        kind = ""
    if ("v7" in kind) or ("tpu7" in kind) or ("7x" in kind):
        return getattr(pltpu, "CORE_PARALLEL", "parallel")
    return "parallel"


# ------------------------------- kernels ------------------------------------


def _fused_linear_kernel(x_ref, w_ref, b_ref, o_ref):
    # One batch tile: (TM, C) @ (C, O_pad) on the MXU with f32 accumulation;
    # bias (1, O_pad) broadcasts over rows on the VPU.  Weight / bias blocks
    # have constant indices (and Buffered(1)) so one copy stays VMEM-resident.
    o_ref[...] = (
        jnp.dot(x_ref[...], w_ref[...], preferred_element_type=jnp.float32)
        + b_ref[...]
    ).astype(o_ref.dtype)


def _fused_linear_ktiled_kernel(x_ref, w_ref, b_ref, o_ref, acc_ref):
    # Fallback when W_cat does not fit VMEM: reduce over C in TK-sized steps
    # with an f32 accumulator (init at k == 0, bias + store at the last k).
    k = pl.program_id(1)

    @pl.when(k == 0)
    def _():
        acc_ref[...] = jnp.zeros_like(acc_ref)

    acc_ref[...] += jnp.dot(
        x_ref[...], w_ref[...], preferred_element_type=jnp.float32
    )

    @pl.when(k == pl.num_programs(1) - 1)
    def _():
        o_ref[...] = (acc_ref[...] + b_ref[...]).astype(o_ref.dtype)


# ------------------------------- wrapper -------------------------------------


def inception_block_forward(
    x,
    w_cat,
    b_cat,
    *,
    tm_max=1024,
    tk=512,
    compute_dtype=None,
    out_dtype=None,
    force_k_tiling=False,
):
    """out = x @ w_cat + b_cat  (== concat of the 4 nn.Linear outputs).

    x: (B, C), w_cat: (C, O), b_cat: (1, O) or (O,).
    compute_dtype: optional bf16 fast path (x/W cast; f32 accumulation).
    """
    B, C = x.shape
    O = w_cat.shape[1]
    b_cat = jnp.asarray(b_cat).reshape(1, O)

    out_dtype = jnp.dtype(out_dtype) if out_dtype is not None else x.dtype
    if compute_dtype is not None:
        x = x.astype(compute_dtype)
        w_cat = w_cat.astype(compute_dtype)
    b_cat = b_cat.astype(jnp.float32)  # bias added on the f32 accumulator

    esize = jnp.dtype(x.dtype).itemsize
    osize = jnp.dtype(out_dtype).itemsize
    sub = 8 * max(1, 4 // esize)  # sublane multiple: 8 for f32, 16 for bf16

    vmem_cap = _vmem_capacity_bytes()
    batch_sem = _batch_axis_semantics()

    # Lane-dense output: pad concat axis up to a multiple of 128 (full vst).
    O_pad = _round_up(O, 128)
    weight_bytes = C * O_pad * esize
    bias_bytes = O_pad * 4

    use_k_tiling = force_k_tiling or (weight_bytes > int(0.45 * vmem_cap))

    def _pick_tm(budget, per_row):
        # Largest tile that fits the VMEM budget, then shrink adaptively so
        # the last batch tile wastes at most one sublane group of padding.
        tm_cap = max(sub, (budget // max(per_row, 1)) // sub * sub)
        cap = max(sub, min(_round_up(tm_max, sub), tm_cap))
        if B <= cap:
            return _round_up(B, sub)
        n_tiles = _cdiv(B, cap)
        return _round_up(_cdiv(B, n_tiles), sub)

    if not use_k_tiling:
        # ---------------- resident-weight path: grid over batch only --------
        per_row = 2 * C * esize + 2 * O_pad * osize  # dbl-buffered x / out
        budget = int(0.75 * vmem_cap) - weight_bytes - bias_bytes
        tm = _pick_tm(budget, per_row)
        B_pad = _round_up(B, tm)

        if B_pad != B:
            x = jnp.pad(x, ((0, B_pad - B), (0, 0)))
        if O_pad != O:
            w_cat = jnp.pad(w_cat, ((0, 0), (0, O_pad - O)))
            b_cat = jnp.pad(b_cat, ((0, 0), (0, O_pad - O)))

        vmem_need = weight_bytes + bias_bytes + tm * per_row
        grid = (B_pad // tm,)
        kernel = _fused_linear_kernel
        flop_k = C

        def _in_specs(const_kwargs):
            return [
                pl.BlockSpec((tm, C), lambda i: (i, 0)),            # streams
                pl.BlockSpec((C, O_pad), lambda i: (0, 0),
                             **const_kwargs),                       # resident
                pl.BlockSpec((1, O_pad), lambda i: (0, 0),
                             **const_kwargs),                       # resident
            ]

        out_specs = pl.BlockSpec((tm, O_pad), lambda i: (i, 0))
        scratch_shapes = []
        dim_sem = (batch_sem,)
    else:
        # ---------------- K-tiled fallback: W_cat too large for VMEM --------
        # TODO(synk): add O-axis tiling as well for extremely wide outputs.
        tk_eff = max(128, _round_up(min(tk, C), 128))
        C_pad = _round_up(C, tk_eff)

        per_row = 2 * tk_eff * esize + 2 * O_pad * osize + O_pad * 4
        budget = int(0.75 * vmem_cap) - 2 * tk_eff * O_pad * esize - bias_bytes
        tm = _pick_tm(budget, per_row)
        B_pad = _round_up(B, tm)

        if B_pad != B or C_pad != C:
            x = jnp.pad(x, ((0, B_pad - B), (0, C_pad - C)))
        if C_pad != C or O_pad != O:
            w_cat = jnp.pad(w_cat, ((0, C_pad - C), (0, O_pad - O)))
        if O_pad != O:
            b_cat = jnp.pad(b_cat, ((0, 0), (0, O_pad - O)))

        vmem_need = 2 * tk_eff * O_pad * esize + bias_bytes + tm * per_row
        grid = (B_pad // tm, C_pad // tk_eff)
        kernel = _fused_linear_ktiled_kernel
        flop_k = C_pad

        def _in_specs(const_kwargs):
            return [
                pl.BlockSpec((tm, tk_eff), lambda i, k: (i, k)),
                pl.BlockSpec((tk_eff, O_pad), lambda i, k: (k, 0)),
                pl.BlockSpec((1, O_pad), lambda i, k: (0, 0),
                             **const_kwargs),
            ]

        out_specs = pl.BlockSpec((tm, O_pad), lambda i, k: (i, 0))
        scratch_shapes = [pltpu.VMEM((tm, O_pad), jnp.float32)]
        dim_sem = (batch_sem, "arbitrary")

    # VMEM limit: actual need + 30% headroom + 2 MiB, clamped to ~90% of this
    # generation's physical VMEM (~115 MiB v5e/v6e, ~57 MiB v7x).
    vmem_limit = int(
        min(max(int(1.3 * vmem_need) + (2 << 20), 8 << 20), int(0.9 * vmem_cap))
    )

    def _call(single_buffer_consts):
        const_kwargs = (
            {"pipeline_mode": pl.Buffered(1)} if single_buffer_consts else {}
        )
        return pl.pallas_call(
            kernel,
            out_shape=jax.ShapeDtypeStruct((B_pad, O_pad), out_dtype),
            grid_spec=pltpu.PrefetchScalarGridSpec(
                num_scalar_prefetch=0,
                grid=grid,
                in_specs=_in_specs(const_kwargs),
                out_specs=out_specs,
                scratch_shapes=scratch_shapes,
            ),
            compiler_params=pltpu.CompilerParams(
                dimension_semantics=dim_sem,
                vmem_limit_bytes=vmem_limit,
            ),
            cost_estimate=pl.CostEstimate(
                flops=2 * B_pad * flop_k * O_pad,
                transcendentals=0,
                bytes_accessed=(
                    B_pad * x.shape[1] * esize
                    + x.shape[1] * O_pad * esize
                    + O_pad * 4
                    + B_pad * O_pad * osize
                ),
            ),
        )(x, w_cat, b_cat)

    try:
        out = _call(True)
    except Exception:
        # Fallback for JAX builds without BlockSpec.pipeline_mode / Buffered;
        # only cost is one extra (double-buffered) resident weight copy.
        out = _call(False)

    # Skip the extra slice pass entirely when nothing was padded.
    if B_pad == B and O_pad == O:
        return out
    return out[:B, :O]


# ------------------------------- params --------------------------------------


def init_inception_params(key, in_channels):
    """Deterministic init matching the PyTorch module's layer shapes.

    nn.Linear(in, out) stores weight (out, in) and bias (out,), initialized
    U(-1/sqrt(in), 1/sqrt(in)).  We build each layer, then concatenate the
    (transposed) weights along the output axis so the kernel does one fused
    matmul.  (RNG will not bit-match PyTorch; math is identical.)
    """
    out_dims = [
        math.ceil(in_channels / 2),
        int(in_channels / 4),
        math.ceil(in_channels / 12),
        int(in_channels / 6),
    ]
    bound = 1.0 / math.sqrt(in_channels)
    ws, bs = [], []
    for i, od in enumerate(out_dims):
        kw, kb = jax.random.split(jax.random.fold_in(key, i))
        # (in, out) layout so x @ W matches PyTorch's x @ weight.T
        ws.append(
            jax.random.uniform(kw, (in_channels, od), jnp.float32, -bound, bound)
        )
        bs.append(jax.random.uniform(kb, (od,), jnp.float32, -bound, bound))
    w_cat = jnp.concatenate(ws, axis=1)             # (C, O_total)
    b_cat = jnp.concatenate(bs, axis=0)[None, :]    # (1, O_total)
    return w_cat, b_cat, out_dims


if __name__ == "__main__":
    key = jax.random.PRNGKey(0)
    B, C = 8, 32  # small shapes: batch=8, in_channels=32

    kx, kp = jax.random.split(key)
    x = jax.random.normal(kx, (B, C), jnp.float32)
    w_cat, b_cat, out_dims = init_inception_params(kp, C)

    out = jax.block_until_ready(inception_block_forward(x, w_cat, b_cat))
    ref = x @ w_cat + b_cat
    assert out.shape == (B, sum(out_dims)), out.shape
    assert jnp.allclose(out, ref, atol=1e-5, rtol=1e-5), "mismatch vs reference"

    # Larger, non-aligned batch: exercises the adaptive-tm tiled path.
    B2 = 500
    x2 = jax.random.normal(jax.random.fold_in(key, 7), (B2, C), jnp.float32)
    out2 = jax.block_until_ready(inception_block_forward(x2, w_cat, b_cat))
    ref2 = x2 @ w_cat + b_cat
    assert out2.shape == (B2, sum(out_dims)), out2.shape
    assert jnp.allclose(out2, ref2, atol=1e-5, rtol=1e-5), "mismatch (tiled path)"

    # K-tiled fallback path (forced; normally used when W_cat can't stay
    # resident in this generation's VMEM).
    C3, B3 = 256, 300
    kx3, kp3 = jax.random.split(jax.random.fold_in(key, 13))
    x3 = jax.random.normal(kx3, (B3, C3), jnp.float32)
    w3, b3, dims3 = init_inception_params(kp3, C3)
    out3 = jax.block_until_ready(
        inception_block_forward(x3, w3, b3, force_k_tiling=True, tk=128)
    )
    ref3 = x3 @ w3 + b3
    assert out3.shape == (B3, sum(dims3)), out3.shape
    assert jnp.allclose(out3, ref3, atol=1e-4, rtol=1e-4), "mismatch (k-tiled path)"

    # Optional bf16 fast path (halves HBM traffic; looser tolerance).
    out_bf = jax.block_until_ready(
        inception_block_forward(x2, w_cat, b_cat, compute_dtype=jnp.bfloat16)
    )
    assert jnp.allclose(out_bf, ref2, atol=1e-1, rtol=1e-1), "mismatch (bf16 path)"

    print("KERNEL_OK")
</pallas_src>

<mosaic_0001>
module attributes {stable_mosaic.version = 11 : i64} {
  func.func @_fused_linear_kernel(%arg0: i32, %arg1: memref<8x32xf32, #tpu.memory_space<vmem>>, %arg2: memref<32x128xf32, #tpu.memory_space<vmem>>, %arg3: memref<1x128xf32, #tpu.memory_space<vmem>>, %arg4: memref<8x128xf32, #tpu.memory_space<vmem>>) attributes {dimension_semantics = [#tpu.dimension_semantics<parallel>], iteration_bounds = array<i64: 1>, scalar_prefetch = 0 : i64, scratch_operands = 0 : i64, tpu.core_type = #tpu.core_type<tc>, window_params = [{transform_indices = @transform_0, window_bounds = array<i64: 8, 32>}, {pipeline_mode = #tpu.pipeline_mode<synchronous>, transform_indices = @transform_1, window_bounds = array<i64: 32, 128>}, {pipeline_mode = #tpu.pipeline_mode<synchronous>, transform_indices = @transform_2, window_bounds = array<i64: 1, 128>}, {transform_indices = @transform_3, window_bounds = array<i64: 8, 128>}]} {
    %c0 = arith.constant 0 : index
    %c0_0 = arith.constant 0 : index
    %0 = vector.load %arg1[%c0, %c0_0] : memref<8x32xf32, #tpu.memory_space<vmem>>, vector<8x32xf32>
    %c0_1 = arith.constant 0 : index
    %c0_2 = arith.constant 0 : index
    %1 = vector.load %arg2[%c0_1, %c0_2] : memref<32x128xf32, #tpu.memory_space<vmem>>, vector<32x128xf32>
    %cst = arith.constant dense<0.000000e+00> : vector<8x128xf32>
    %2 = tpu.matmul %0, %1, %cst {dimension_numbers = #tpu.dot_dimension_numbers<[1], [0], [0], [1], [0, 0, 1, 1], [], []>} : vector<8x32xf32>, vector<32x128xf32>, vector<8x128xf32> -> vector<8x128xf32>
    %c0_3 = arith.constant 0 : index
    %c0_4 = arith.constant 0 : index
    %3 = vector.load %arg3[%c0_3, %c0_4] : memref<1x128xf32, #tpu.memory_space<vmem>>, vector<1x128xf32>
    %4 = vector.broadcast %3 : vector<1x128xf32> to vector<8x128xf32>
    %5 = arith.addf %2, %4 : vector<8x128xf32>
    %c0_5 = arith.constant 0 : index
    %c0_6 = arith.constant 0 : index
    %6 = vector.load %arg4[%c0_5, %c0_6] : memref<8x128xf32, #tpu.memory_space<vmem>>, vector<8x128xf32>
    tpu.vector_store %arg4[%c0_5, %c0_6], %5 {strides = array<i32>} : memref<8x128xf32, #tpu.memory_space<vmem>>, vector<8x128xf32>,
    return
  }
  func.func @transform_0(%arg0: i32) -> (i32, i32) {
    %c0_i32 = arith.constant 0 : i32
    %c0_i32_0 = arith.constant 0 : i32
    return %arg0, %c0_i32 : i32, i32
  }
  func.func @transform_1(%arg0: i32) -> (i32, i32) {
    %c0_i32 = arith.constant 0 : i32
    %c0_i32_0 = arith.constant 0 : i32
    %c0_i32_1 = arith.constant 0 : i32
    return %c0_i32, %c0_i32_0 : i32, i32
  }
  func.func @transform_2(%arg0: i32) -> (i32, i32) {
    %c0_i32 = arith.constant 0 : i32
    %c0_i32_0 = arith.constant 0 : i32
    %c0_i32_1 = arith.constant 0 : i32
    return %c0_i32, %c0_i32_0 : i32, i32
  }
  func.func @transform_3(%arg0: i32) -> (i32, i32) {
    %c0_i32 = arith.constant 0 : i32
    %c0_i32_0 = arith.constant 0 : i32
    return %arg0, %c0_i32 : i32, i32
  }
}

module attributes {stable_mosaic.version = 11 : i64} {
  func.func @_fused_linear_kernel(%arg0: i32, %arg1: memref<8x32xf32, #tpu.memory_space<vmem>>, %arg2: memref<32x128xf32, #tpu.memory_space<vmem>>, %arg3: memref<1x128xf32, #tpu.memory_space<vmem>>, %arg4: memref<8x128xf32, #tpu.memory_space<vmem>>) attributes {dimension_semantics = [#tpu.dimension_semantics<parallel>], iteration_bounds = array<i64: 1>, scalar_prefetch = 0 : i64, scratch_operands = 0 : i64, tpu.core_type = #tpu.core_type<tc>, window_params = [{transform_indices = @transform_0, window_bounds = array<i64: 8, 32>}, {pipeline_mode = #tpu.pipeline_mode<synchronous>, transform_indices = @transform_1, window_bounds = array<i64: 32, 128>}, {pipeline_mode = #tpu.pipeline_mode<synchronous>, transform_indices = @transform_2, window_bounds = array<i64: 1, 128>}, {transform_indices = @transform_3, window_bounds = array<i64: 8, 128>}]} {
    %c0 = arith.constant 0 : index
    %c0_0 = arith.constant 0 : index
    %0 = vector.load %arg1[%c0, %c0_0] : memref<8x32xf32, #tpu.memory_space<vmem>>, vector<8x32xf32>
    %c0_1 = arith.constant 0 : index
    %c0_2 = arith.constant 0 : index
    %1 = vector.load %arg2[%c0_1, %c0_2] : memref<32x128xf32, #tpu.memory_space<vmem>>, vector<32x128xf32>
    %cst = arith.constant dense<0.000000e+00> : vector<8x128xf32>
    %2 = tpu.matmul %0, %1, %cst {dimension_numbers = #tpu.dot_dimension_numbers<[1], [0], [0], [1], [0, 0, 1, 1], [], []>} : vector<8x32xf32>, vector<32x128xf32>, vector<8x128xf32> -> vector<8x128xf32>
    %c0_3 = arith.constant 0 : index
    %c0_4 = arith.constant 0 : index
    %3 = vector.load %arg3[%c0_3, %c0_4] : memref<1x128xf32, #tpu.memory_space<vmem>>, vector<1x128xf32>
    %4 = vector.broadcast %3 : vector<1x128xf32> to vector<8x128xf32>
    %5 = arith.addf %2, %4 : vector<8x128xf32>
    %c0_5 = arith.constant 0 : index
    %c0_6 = arith.constant 0 : index
    %6 = vector.load %arg4[%c0_5, %c0_6] : memref<8x128xf32, #tpu.memory_space<vmem>>, vector<8x128xf32>
    tpu.vector_store %arg4[%c0_5, %c0_6], %5 {strides = array<i32>} : memref<8x128xf32, #tpu.memory_space<vmem>>, vector<8x128xf32>,
    return
  }
  func.func @transform_0(%arg0: i32) -> (i32, i32) {
    %c0_i32 = arith.constant 0 : i32
    %c0_i32_0 = arith.constant 0 : i32
    return %arg0, %c0_i32 : i32, i32
  }
  func.func @transform_1(%arg0: i32) -> (i32, i32) {
    %c0_i32 = arith.constant 0 : i32
    %c0_i32_0 = arith.constant 0 : i32
    %c0_i32_1 = arith.constant 0 : i32
    return %c0_i32, %c0_i32_0 : i32, i32
  }
  func.func @transform_2(%arg0: i32) -> (i32, i32) {
    %c0_i32 = arith.constant 0 : i32
    %c0_i32_0 = arith.constant 0 : i32
    %c0_i32_1 = arith.constant 0 : i32
    return %c0_i32, %c0_i32_0 : i32, i32
  }
  func.func @transform_3(%arg0: i32) -> (i32, i32) {
    %c0_i32 = arith.constant 0 : i32
    %c0_i32_0 = arith.constant 0 : i32
    return %arg0, %c0_i32 : i32, i32
  }
}

</mosaic_0001>

<bundles_post_ra>
// kernel: tpu_custom_call.1
= control target key start
LH: loop header
LB: loop body
LE: loop exit
PB: predicated region body
PF: predicated region fallthrough
CT: control target
= control target key end

     0   :  { %8 = vsyncpa [#allocation3], 0  ;;  %s274_s0 = inlined_call_operand.hbm [shape: f32[8,32], index: 0, kind: input, shape index: {}]   ;;  %s275_s1 = inlined_call_operand.hbm [shape: f32[32,128], index: 1, kind: input, shape index: {}]   ;;  %s276_s2 = inlined_call_operand.vmem [shape: f32[1,128], index: 2, kind: input, shape index: {}]   ;;  %s277_s3 = inlined_call_operand.hbm [shape: f32[8,128], index: 3, kind: output, shape index: {}]  }
   0x1   :  { %9 = vsyncpa [#allocation6], 0 }
   0x2   :  { %10 = vsyncpa [#allocation4], 0  ;;  %s235_s12 = smov [#allocation2]   ;;  %s236_s14 = smov [#allocation5]  }
   0x3   :  { %s17_s13 = sshll.u32 %s235_s12, 4  ;;  %s26_s15 = sshll.u32 %s236_s14, 4  ;;  %s18_s13 = int_to_ptr.vmem [resolvable:$true] %s17_s13  ;;  %s27_s15 = int_to_ptr.vmem [resolvable:$true] %s26_s15 }
   0x4   :  { %s177_s16 = scalar_lea.vmem %s18_s13, 128  ;;  %p182_p1 = scmp.lt.s32.totalorder %s18_s13, %s18_s13 }
   0x5   :  { %p178_p0 = scmp.ne.s32.totalorder %s18_s13, %s177_s16  ;;  %p183_p2 = scmp.lt.s32.totalorder %s177_s16, %s177_s16 }
   0x7   :  { %p184_p3 = por %p183_p2, %p182_p1 }
   0x9   :  { %p185_p4 = pnand %p184_p3, %p178_p0 }
   0xb   :  { %188 = shalt.err (!%p185_p4)
}
   0xc   :  { %20 = dma.hbm_to_vmem [thread:$0]  %s274_s0, 128, %s18_s13, [#allocation3]  }
   0xd   :  { %s197_s19 = scalar_lea.vmem %s27_s15, 512  ;;  %p202_p6 = scmp.lt.s32.totalorder %s27_s15, %s27_s15 }
   0xe   :  { %p198_p5 = scmp.ne.s32.totalorder %s27_s15, %s197_s19  ;;  %p203_p7 = scmp.lt.s32.totalorder %s197_s19, %s197_s19 }
  0x10   :  { %p204_p8 = por %p203_p7, %p202_p6 }
  0x12   :  { %p205_p9 = pnand %p204_p8, %p198_p5 }
  0x14   :  { %208 = shalt.err (!%p205_p9)
}
  0x15   :  { %s237_s20 = smov 128   ;;  %s238_s21 = smov 8  }
  0x16   :  { %32 = dma.hbm_to_vmem [thread:$0]  %s275_s1, 512, %s27_s15, [#allocation6], %s237_s20, %s237_s20, %s238_s21  }
  0x17   :  { %229 = dma.done.wait [#allocation3], 128  }
  0x18   :  { %230 = vsyncadd [#allocation3], 4294967168 }
  0x19   :  { %231 = dma.done.wait [#allocation6], 512  }
  0x1a   :  { %232 = vsyncadd [#allocation6], 4294966784  ;;  %v239_v0 = vmov 0.0   ;;  %vm240_vm0 = vmmov 0   ;;  %v45_v1 = vld [vmem:[#allocation5 + $0x18] sm:$0xff]  ;;  %v44_v2 = vld [vmem:[#allocation5 + $0x10] sm:$0xff] }
  0x1b   :  { %151 = vmatprep.subr.mxu0 %v239_v0  ;;  %159 = vmatprep.mubr.msk.f32.mxu0 %vm240_vm0, %v239_v0  ;;  %v43_v3 = vld [vmem:[#allocation5 + $0x8] sm:$0xff]  ;;  %v42_v4 = vld [vmem:[#allocation5] sm:$0xff]  ;;  %v41_v5 = vld [vmem:[#allocation2] sm:$0xff]  ;;  %vm53_vm1 = vcmask 261120   ;;  %s241_s24 = smov [#allocation7]  }
  0x1c   :  { %152 = vmatpush3.msra.mxu0 %v45_v1  ;;  %v144_v6 = vld [vmem:[%s276_s2] ss:$0 sm:$0xff]  ;;  %s134_s25 = sshll.u32 %s241_s24, 4  ;;  %s135_s25 = int_to_ptr.vmem [resolvable:$true] %s134_s25 }
  0x1d   :  { %153 = vmatprep.subr.mxu0 %v239_v0  ;;  %s209_s26 = scalar_lea.vmem %s135_s25, 128  ;;  %p214_p11 = scmp.lt.s32.totalorder %s135_s25, %s135_s25 }
  0x1e   :  { %154 = vmatpush3.msra.mxu0 %v44_v2  ;;  %p210_p10 = scmp.ne.s32.totalorder %s135_s25, %s209_s26  ;;  %p215_p12 = scmp.lt.s32.totalorder %s209_s26, %s209_s26 }
  0x1f   :  { %155 = vmatprep.subr.mxu0 %v239_v0 }
  0x20   :  { %156 = vmatpush3.msra.mxu0 %v43_v3  ;;  %p216_p13 = por %p215_p12, %p214_p11 }
  0x21   :  { %157 = vmatprep.subr.mxu0 %v239_v0 }
  0x22   :  { %158 = vmatpush3.msra.mxu0 %v42_v4  ;;  %p217_p0 = pnand %p216_p13, %p210_p10 }
  0x23   :  { %160 = vmatmul.mubr.msk.f32.vlgmr.msra.gmra.mxu0 %vm53_vm1, %v41_v5 }
  0xe3   :  { %v123_v7 = vpop.f32.mrf.mxu0 }
  0xe4   :  { %v124_v8 = vadd.f32 %v144_v6, %v123_v7 }
  0xe5   :  { %v161_v9 = vpop.f32.mrf.mxu0 }
  0xe6   :  { %127 = vst [vmem:[#allocation7] sm:$0xff] %v124_v8 }
  0xe7   :  { %220 = shalt.err (!%p217_p0)
}
  0xe8   :  { %137 = dma.vmem_to_hbm [thread:$0]  %s135_s25, 128, %s277_s3, [#allocation4]  }
  0xe9   :  { %233 = dma.done.wait [#allocation4], 128  }
  0xea   :  { %234 = vsyncadd [#allocation4], 4294967168 }
  0xeb   :  { %141 = vsyncpa [#allocation3], 1 }
  0xec   :  { %142 = vsyncpa [#allocation6], 1 }
  0xed   :  { %143 = vsyncpa [#allocation4], 1 }

// kernel: tpu_custom_call.1
= control target key start
LH: loop header
LB: loop body
LE: loop exit
PB: predicated region body
PF: predicated region fallthrough
CT: control target
= control target key end

     0   :  { %8 = vsyncpa [#allocation3], 0  ;;  %s274_s0 = inlined_call_operand.hbm [shape: f32[8,32], index: 0, kind: input, shape index: {}]   ;;  %s275_s1 = inlined_call_operand.hbm [shape: f32[32,128], index: 1, kind: input, shape index: {}]   ;;  %s276_s2 = inlined_call_operand.vmem [shape: f32[1,128], index: 2, kind: input, shape index: {}]   ;;  %s277_s3 = inlined_call_operand.hbm [shape: f32[8,128], index: 3, kind: output, shape index: {}]  }
   0x1   :  { %9 = vsyncpa [#allocation6], 0 }
   0x2   :  { %10 = vsyncpa [#allocation4], 0  ;;  %s235_s12 = smov [#allocation2]   ;;  %s236_s14 = smov [#allocation5]  }
   0x3   :  { %s17_s13 = sshll.u32 %s235_s12, 4  ;;  %s26_s15 = sshll.u32 %s236_s14, 4  ;;  %s18_s13 = int_to_ptr.vmem [resolvable:$true] %s17_s13  ;;  %s27_s15 = int_to_ptr.vmem [resolvable:$true] %s26_s15 }
   0x4   :  { %s177_s16 = scalar_lea.vmem %s18_s13, 128  ;;  %p182_p1 = scmp.lt.s32.totalorder %s18_s13, %s18_s13 }
   0x5   :  { %p178_p0 = scmp.ne.s32.totalorder %s18_s13, %s177_s16  ;;  %p183_p2 = scmp.lt.s32.totalorder %s177_s16, %s177_s16 }
   0x7   :  { %p184_p3 = por %p183_p2, %p182_p1 }
   0x9   :  { %p185_p4 = pnand %p184_p3, %p178_p0 }
   0xb   :  { %188 = shalt.err (!%p185_p4)
}
   0xc   :  { %20 = dma.hbm_to_vmem [thread:$0]  %s274_s0, 128, %s18_s13, [#allocation3]  }
   0xd   :  { %s197_s19 = scalar_lea.vmem %s27_s15, 512  ;;  %p202_p6 = scmp.lt.s32.totalorder %s27_s15, %s27_s15 }
   0xe   :  { %p198_p5 = scmp.ne.s32.totalorder %s27_s15, %s197_s19  ;;  %p203_p7 = scmp.lt.s32.totalorder %s197_s19, %s197_s19 }
  0x10   :  { %p204_p8 = por %p203_p7, %p202_p6 }
  0x12   :  { %p205_p9 = pnand %p204_p8, %p198_p5 }
  0x14   :  { %208 = shalt.err (!%p205_p9)
}
  0x15   :  { %s237_s20 = smov 128   ;;  %s238_s21 = smov 8  }
  0x16   :  { %32 = dma.hbm_to_vmem [thread:$0]  %s275_s1, 512, %s27_s15, [#allocation6], %s237_s20, %s237_s20, %s238_s21  }
  0x17   :  { %229 = dma.done.wait [#allocation3], 128  }
  0x18   :  { %230 = vsyncadd [#allocation3], 4294967168 }
  0x19   :  { %231 = dma.done.wait [#allocation6], 512  }
  0x1a   :  { %232 = vsyncadd [#allocation6], 4294966784  ;;  %v239_v0 = vmov 0.0   ;;  %vm240_vm0 = vmmov 0   ;;  %v45_v1 = vld [vmem:[#allocation5 + $0x18] sm:$0xff]  ;;  %v44_v2 = vld [vmem:[#allocation5 + $0x10] sm:$0xff] }
  0x1b   :  { %151 = vmatprep.subr.mxu0 %v239_v0  ;;  %159 = vmatprep.mubr.msk.f32.mxu0 %vm240_vm0, %v239_v0  ;;  %v43_v3 = vld [vmem:[#allocation5 + $0x8] sm:$0xff]  ;;  %v42_v4 = vld [vmem:[#allocation5] sm:$0xff]  ;;  %v41_v5 = vld [vmem:[#allocation2] sm:$0xff]  ;;  %vm53_vm1 = vcmask 261120   ;;  %s241_s24 = smov [#allocation7]  }
  0x1c   :  { %152 = vmatpush3.msra.mxu0 %v45_v1  ;;  %v144_v6 = vld [vmem:[%s276_s2] ss:$0 sm:$0xff]  ;;  %s134_s25 = sshll.u32 %s241_s24, 4  ;;  %s135_s25 = int_to_ptr.vmem [resolvable:$true] %s134_s25 }
  0x1d   :  { %153 = vmatprep.subr.mxu0 %v239_v0  ;;  %s209_s26 = scalar_lea.vmem %s135_s25, 128  ;;  %p214_p11 = scmp.lt.s32.totalorder %s135_s25, %s135_s25 }
  0x1e   :  { %154 = vmatpush3.msra.mxu0 %v44_v2  ;;  %p210_p10 = scmp.ne.s32.totalorder %s135_s25, %s209_s26  ;;  %p215_p12 = scmp.lt.s32.totalorder %s209_s26, %s209_s26 }
  0x1f   :  { %155 = vmatprep.subr.mxu0 %v239_v0 }
  0x20   :  { %156 = vmatpush3.msra.mxu0 %v43_v3  ;;  %p216_p13 = por %p215_p12, %p214_p11 }
  0x21   :  { %157 = vmatprep.subr.mxu0 %v239_v0 }
  0x22   :  { %158 = vmatpush3.msra.mxu0 %v42_v4  ;;  %p217_p0 = pnand %p216_p13, %p210_p10 }
  0x23   :  { %160 = vmatmul.mubr.msk.f32.vlgmr.msra.gmra.mxu0 %vm53_vm1, %v41_v5 }
  0xe3   :  { %v123_v7 = vpop.f32.mrf.mxu0 }
  0xe4   :  { %v124_v8 = vadd.f32 %v144_v6, %v123_v7 }
  0xe5   :  { %v161_v9 = vpop.f32.mrf.mxu0 }
  0xe6   :  { %127 = vst [vmem:[#allocation7] sm:$0xff] %v124_v8 }
  0xe7   :  { %220 = shalt.err (!%p217_p0)
}
  0xe8   :  { %137 = dma.vmem_to_hbm [thread:$0]  %s135_s25, 128, %s277_s3, [#allocation4]  }
  0xe9   :  { %233 = dma.done.wait [#allocation4], 128  }
  0xea   :  { %234 = vsyncadd [#allocation4], 4294967168 }
  0xeb   :  { %141 = vsyncpa [#allocation3], 1 }
  0xec   :  { %142 = vsyncpa [#allocation6], 1 }
  0xed   :  { %143 = vsyncpa [#allocation4], 1 }

</bundles_post_ra>
